<compile_context>
chip_gen: v5e
topology: v5e:2x2
jax: 0.10.0
libtpu: 0.0.40
codegen_flags: <defaults>
</compile_context>

<pallas_src>
import functools
import math

import jax
import jax.numpy as jnp
from jax.experimental import pallas as pl
from jax.experimental.pallas import tpu as pltpu


# ---------------------------------------------------------------------------
# One-time capability probe: direction of pltpu.roll (done once, cached).
# ---------------------------------------------------------------------------
def _roll_probe_kernel(x_ref, o_ref):
    o_ref[...] = pltpu.roll(x_ref[...], shift=1, axis=1)


@functools.lru_cache(maxsize=None)
def _roll_matches_jnp_roll() -> bool:
    """True iff pltpu.roll(x, 1, axis)[..., l] == x[..., l-1] (jnp.roll)."""
    x = jax.lax.broadcasted_iota(jnp.int32, (8, 128), 1)
    out = pl.pallas_call(
        _roll_probe_kernel,
        out_shape=jax.ShapeDtypeStruct((8, 128), jnp.int32),
    )(x)
    return bool(out[0, 1] == 0)


# ---------------------------------------------------------------------------
# Kernel
# ---------------------------------------------------------------------------
def _patch_embed_rope_kernel(x_ref, w_ref, b_ref, cos_ref, sa_ref, sb_ref,
                             o_ref, *, images_per_tile):
    # x_ref:   (bpt, N, K)    bf16 flattened patches for bpt images
    # w_ref:   (K, Epad)      bf16 conv weight as matmul (natural channel order)
    # b_ref:   (1, Epad)      f32 bias
    # cos_ref: (N, Epad)      f32 per-position cos, duplicated over (2k, 2k+1)
    # sa_ref:  (N, Epad)      f32 sin table applied to roll(y, 1)
    # sb_ref:  (N, Epad)      f32 sin table applied to roll(y, Epad-1)
    # o_ref:   (bpt, N, Epad) f32 output, module's interleaved channel order
    epad = o_ref.shape[-1]
    w = w_ref[...]
    bias = b_ref[...]
    cos = cos_ref[...]
    sin_a = sa_ref[...]
    sin_b = sb_ref[...]
    for j in range(images_per_tile):                  # static, small unroll
        y = jnp.dot(x_ref[j], w, preferred_element_type=jnp.float32) + bias
        # Pair swap y[2k] <-> y[2k+1] via two lane rotations; the host-built
        # per-lane sin tables (oriented by the probed roll direction) keep the
        # correct rotation per lane parity, so no iota/where is needed.
        r1 = pltpu.roll(y, shift=1, axis=1)
        r2 = pltpu.roll(y, shift=epad - 1, axis=1)
        o_ref[j] = (y * cos + r1 * sin_a + r2 * sin_b).astype(o_ref.dtype)


# ---------------------------------------------------------------------------
# Tiling choice: whole images per grid step, sized against a VMEM budget.
# ---------------------------------------------------------------------------
def _images_per_tile(batch, n_patches, k, epad,
                     budget_bytes=16 * 1024 * 1024, max_unroll=32):
    """Largest divisor of `batch` whose double-buffered streamed working set
    (bf16 patches in + f32 embeddings out) fits `budget_bytes`, preferring at
    least two grid steps so "parallel" grid sharding (v7x megacore) has work.
    """
    per_image = 2 * n_patches * (k * 2 + epad * 4)     # x2: double buffering
    max_images = max(1, min(budget_bytes // per_image, max_unroll))
    divisors = [d for d in range(1, batch + 1) if batch % d == 0]
    fitting = [d for d in divisors if d <= max_images] or [1]
    bpt = max(fitting)
    if batch >= 2 and batch // bpt < 2:
        two_plus = [d for d in fitting if batch // d >= 2]
        bpt = max(two_plus) if two_plus else 1
    return bpt


# ---------------------------------------------------------------------------
# Forward pass (jitted end to end)
# ---------------------------------------------------------------------------
@functools.partial(jax.jit, static_argnums=(4, 5))
def _patch_embedding_rope_impl(x, weight, bias, freqs, patch_size, roll_is_jnp):
    B, C, H, W = x.shape
    P = patch_size
    Hp, Wp = H // P, W // P
    N = Hp * Wp
    E = weight.shape[0]
    K = C * P * P
    half = E // 2
    Epad = ((E + 127) // 128) * 128
    pad = Epad - E
    assert freqs.shape == (N, half)

    # ---- patch extraction (wrapper glue; XLA fuses the cast+transpose).
    # bf16 so the materialized patch matrix costs half the HBM traffic and
    # feeds the MXU directly.
    # TODO(synk): fuse the im2col into the kernel (grid over batch x patch-row
    # reading (C, P, W) slabs) so the patch matrix never round-trips HBM.
    xp = x.astype(jnp.bfloat16).reshape(B, C, Hp, P, Wp, P)
    patches = jnp.transpose(xp, (0, 2, 4, 1, 3, 5)).reshape(B, N, K)

    # ---- conv-as-matmul weight / bias, natural (interleaved) channel order,
    # lane-padded to a multiple of 128 for lane-dense unmasked stores.
    w_mat = jnp.pad(weight.reshape(E, K).T, ((0, 0), (0, pad))).astype(jnp.bfloat16)
    b_row = jnp.pad(bias.astype(jnp.float32), (0, pad)).reshape(1, Epad)

    # ---- RoPE tables: one (N, Epad) copy each, grid-invariant (DMA'd once),
    # reused for every image of a tile inside the kernel.
    cos = jnp.cos(freqs).astype(jnp.float32)                   # (N, half)
    sin = jnp.sin(freqs).astype(jnp.float32)
    zero = jnp.zeros_like(sin)
    cos_i = jnp.stack([cos, cos], axis=-1).reshape(N, E)       # c0 c0 c1 c1 ..
    sin_prev = jnp.stack([zero, sin], axis=-1).reshape(N, E)   # wants y[l-1]
    sin_next = jnp.stack([-sin, zero], axis=-1).reshape(N, E)  # wants y[l+1]
    sin_a, sin_b = (sin_prev, sin_next) if roll_is_jnp else (sin_next, sin_prev)
    lane_pad = lambda t: jnp.pad(t, ((0, 0), (0, pad)))
    cos_i, sin_a, sin_b = lane_pad(cos_i), lane_pad(sin_a), lane_pad(sin_b)

    # ---- tiling: whole images per grid step, no row padding / partial tiles.
    bpt = _images_per_tile(B, N, K, Epad)
    G = B // bpt

    kernel = functools.partial(_patch_embed_rope_kernel, images_per_tile=bpt)
    out = pl.pallas_call(
        kernel,
        out_shape=jax.ShapeDtypeStruct((B, N, Epad), jnp.float32),
        grid=(G,),
        in_specs=[
            pl.BlockSpec((bpt, N, K), lambda g: (g, 0, 0)),    # patches (streamed)
            pl.BlockSpec((K, Epad), lambda g: (0, 0)),         # weight (invariant)
            pl.BlockSpec((1, Epad), lambda g: (0, 0)),         # bias
            pl.BlockSpec((N, Epad), lambda g: (0, 0)),         # cos
            pl.BlockSpec((N, Epad), lambda g: (0, 0)),         # sin for roll(+1)
            pl.BlockSpec((N, Epad), lambda g: (0, 0)),         # sin for roll(Epad-1)
        ],
        out_specs=pl.BlockSpec((bpt, N, Epad), lambda g: (g, 0, 0)),
        compiler_params=pltpu.CompilerParams(
            dimension_semantics=("parallel",),
            vmem_limit_bytes=40 * 1024 * 1024,                 # v7x-safe (<64 MiB)
        ),
    )(patches, w_mat, b_row, cos_i, sin_a, sin_b)

    # Only lane padding (when E % 128 != 0) is dropped; the channel order is
    # already the module's interleaved order, so no gather / unpermute pass.
    # TODO(synk): emit bf16 output directly if the downstream consumer allows.
    return out[..., :E] if pad else out


def patch_embedding_rope(x, weight, bias, freqs, patch_size):
    """x: (B, C, H, W) NCHW; weight: (E, C, P, P); bias: (E,); freqs: (N, E//2)."""
    return _patch_embedding_rope_impl(x, weight, bias, freqs, patch_size,
                                      _roll_matches_jnp_roll())


# ---------------------------------------------------------------------------
# Plain-JAX reference reproducing the PyTorch module semantics.
# ---------------------------------------------------------------------------
def _reference(x, weight, bias, freqs, patch_size, matmul_dtype=jnp.float32):
    B, C, H, W = x.shape
    P = patch_size
    Hp, Wp = H // P, W // P
    N = Hp * Wp
    E = weight.shape[0]
    K = C * P * P
    xp = x.reshape(B, C, Hp, P, Wp, P)
    xp = jnp.transpose(xp, (0, 2, 4, 1, 3, 5)).reshape(B, N, K)
    xp = xp.astype(matmul_dtype).astype(jnp.float32)
    w = weight.reshape(E, K).astype(matmul_dtype).astype(jnp.float32)
    y = jnp.einsum('bnk,ek->bne', xp, w) + bias                # (B, N, E)
    y2 = y.reshape(B, N, E // 2, 2)
    ye, yo = y2[..., 0], y2[..., 1]
    cos = jnp.cos(freqs)[None]                                 # (1, N, E//2)
    sin = jnp.sin(freqs)[None]
    re = ye * cos - yo * sin
    im = ye * sin + yo * cos
    return jnp.stack([re, im], axis=-1).reshape(B, N, E)


if __name__ == "__main__":
    # Module hyper-parameters (small, consistent with the forward pass).
    in_channels, patch_size, emb_size, img_size = 4, 4, 32, 16
    B = 2
    N = (img_size // patch_size) ** 2                          # 16 patches
    half = emb_size // 2

    key = jax.random.PRNGKey(0)
    kx, kw, kb = jax.random.split(key, 3)
    x = jax.random.normal(kx, (B, in_channels, img_size, img_size), jnp.float32)
    weight = (jax.random.normal(
        kw, (emb_size, in_channels, patch_size, patch_size), jnp.float32)
        * (1.0 / math.sqrt(in_channels * patch_size * patch_size)))
    bias = jax.random.normal(kb, (emb_size,), jnp.float32) * 0.02

    # Rotary frequency table, identical to the PyTorch _get_freqs buffer.
    inv = jnp.exp(-jnp.arange(0, half, dtype=jnp.float32)
                  * (math.log(10000.0) / (half - 1)))
    positions = jnp.arange(0, N, dtype=jnp.float32)
    freqs = positions[:, None] * inv[None, :]                  # (N, E//2)

    out = jax.block_until_ready(
        patch_embedding_rope(x, weight, bias, freqs, patch_size))
    assert out.shape == (B, N, emb_size)

    # Tight check against a reference that uses the same (intentional) bf16
    # rounding of the matmul operands.
    ref_bf16 = _reference(x, weight, bias, freqs, patch_size,
                          matmul_dtype=jnp.bfloat16)
    assert jnp.allclose(out, ref_bf16, atol=2e-3, rtol=2e-3), \
        "mismatch vs bf16-matched reference"

    # Loose check against the exact f32 module semantics (bf16 MXU operands).
    ref_f32 = _reference(x, weight, bias, freqs, patch_size)
    assert jnp.allclose(out, ref_f32, atol=1e-1, rtol=1e-1), \
        "mismatch vs f32 reference"

    print("KERNEL_OK")
</pallas_src>

<mosaic_0001>
module attributes {stable_mosaic.version = 11 : i64} {
  func.func @_roll_probe_kernel(%arg0: memref<8x128xi32, #tpu.memory_space<vmem>>, %arg1: memref<8x128xi32, #tpu.memory_space<vmem>>) attributes {dimension_semantics = [], scalar_prefetch = 0 : i64, scratch_operands = 0 : i64, tpu.core_type = #tpu.core_type<tc>} {
    %c0 = arith.constant 0 : index
    %c0_0 = arith.constant 0 : index
    %0 = vector.load %arg0[%c0, %c0_0] : memref<8x128xi32, #tpu.memory_space<vmem>>, vector<8x128xi32>
    %c1_i32 = arith.constant 1 : i32
    %1 = tpu.dynamic_rotate %0 by %c1_i32 dim 1 : vector<8x128xi32>, i32 -> vector<8x128xi32>
    %c0_1 = arith.constant 0 : index
    %c0_2 = arith.constant 0 : index
    %2 = vector.load %arg1[%c0_1, %c0_2] : memref<8x128xi32, #tpu.memory_space<vmem>>, vector<8x128xi32>
    tpu.vector_store %arg1[%c0_1, %c0_2], %1 {strides = array<i32>} : memref<8x128xi32, #tpu.memory_space<vmem>>, vector<8x128xi32>,
    return
  }
}

</mosaic_0001>

<bundles_post_ra>
// kernel: tpu_custom_call.1
= control target key start
LH: loop header
LB: loop body
LE: loop exit
PB: predicated region body
PF: predicated region fallthrough
CT: control target
= control target key end

     0   :  { %6 = vsyncpa [#allocation3], 0  ;;  %s118_s0 = inlined_call_operand.hbm [shape: s32[8,128], index: 0, kind: input, shape index: {}]   ;;  %s119_s1 = inlined_call_operand.hbm [shape: s32[8,128], index: 1, kind: output, shape index: {}]  }
   0x1   :  { %7 = vsyncpa [#allocation4], 0  ;;  %s13_s8 = sshll.u32 %s118_s0, 4  ;;  %s99_s9 = smov [#allocation2]   ;;  %s14_s8 = int_to_ptr.hbm [resolvable:$true] %s13_s8 }
   0x2   :  { %s15_s10 = sshll.u32 %s99_s9, 4  ;;  %s16_s10 = int_to_ptr.vmem [resolvable:$true] %s15_s10 }
   0x3   :  { %18 = dma.hbm_to_vmem [thread:$0]  %s14_s8, 128, %s16_s10, [#allocation3]  }
   0x4   :  { %95 = dma.done.wait [#allocation3], 128  }
   0x5   :  { %96 = vsyncadd [#allocation3], 4294967168  ;;  %v23_v0 = vld [vmem:[#allocation2] sm:$0xff]  ;;  %s100_s11 = smov 1   ;;  %s101_s12 = smov [#allocation5]  }
   0x6   :  { %24 = vrot.lane.b32.xlu0 %v23_v0, %s100_s11  ;;  %s32_s13 = sshll.u32 %s101_s12, 4  ;;  %s34_s16 = sshll.u32 %s119_s1, 4  ;;  %s33_s13 = int_to_ptr.vmem [resolvable:$true] %s32_s13  ;;  %s35_s16 = int_to_ptr.hbm [resolvable:$true] %s34_s16 }
  0x78   :  { %v25_v1 = vpop.permute.xlu0 %24 }
  0x79   :  { %26 = vst [vmem:[#allocation5] sm:$0xff] %v25_v1 }
  0x7a   :  { %37 = dma.vmem_to_hbm [thread:$0]  %s33_s13, 128, %s35_s16, [#allocation4]  }
  0x7b   :  { %97 = dma.done.wait [#allocation4], 128  }
  0x7c   :  { %98 = vsyncadd [#allocation4], 4294967168 }
  0x7d   :  { %42 = vsyncpa [#allocation3], 1 }
  0x7e   :  { %43 = vsyncpa [#allocation4], 1 }

</bundles_post_ra>
